<compile_context>
chip_gen: v7x
topology: tpu7x:2x2x1
jax: 0.10.0
libtpu: 0.0.40
codegen_flags: <defaults>
</compile_context>

<pallas_src>
import jax
import jax.numpy as jnp
from jax.experimental import pallas as pl
from jax.experimental.pallas import tpu as pltpu


def _make_kernel(num_linear: int, vpu_tail: bool):
    """Build a fused MLP kernel for `num_linear` Linear layers with ReLU between them."""

    def kernel(*refs):
        x_ref = refs[0]
        o_ref = refs[-1]
        # x arrives f32; cast to bf16 in-kernel (VPU op) for the MXU path.
        h = x_ref[...].astype(jnp.bfloat16)                  # (TB, D_in)
        idx = 1
        # Hidden layers: MXU matmul (bf16 operands, f32 accumulate) + bias + ReLU.
        for _ in range(num_linear - 1):
            w_ref, b_ref = refs[idx], refs[idx + 1]
            idx += 2
            z = jnp.dot(h, w_ref[...], preferred_element_type=jnp.float32)
            z = z + b_ref[...]                               # (1, H) f32 broadcast
            h = jnp.maximum(z, 0.0).astype(jnp.bfloat16)
        # Final layer.
        w_ref, b_ref = refs[idx], refs[idx + 1]
        if vpu_tail:
            # output_dim == 1: VPU multiply + lane reduce instead of a degenerate MXU pass.
            w_row = w_ref[...].astype(jnp.float32)           # (1, H) f32
            y = jnp.sum(h.astype(jnp.float32) * w_row, axis=-1, keepdims=True)
            y = y + b_ref[...]                               # (1, 1) f32 broadcast
        else:
            y = jnp.dot(h, w_ref[...], preferred_element_type=jnp.float32)
            y = y + b_ref[...]
        o_ref[...] = y.astype(o_ref.dtype)

    return kernel


def configurable_net_forward(x, weights, biases, *, tb=512):
    """Fused ConfigurableNet forward.

    x:       (B, input_dim) f32
    weights: list of PyTorch-layout (out_features, in_features) f32 matrices
    biases:  list of (out_features,) f32 vectors
    Returns  (B, output_dim) f32.
    """
    assert len(weights) == len(biases) and len(weights) >= 2
    assert tb % 8 == 0, "batch tile must be a multiple of 8 (sublane constraint)"
    num_linear = len(weights)
    out_dim = weights[-1].shape[0]
    vpu_tail = out_dim == 1

    B, d_in = x.shape
    n_tiles = pl.cdiv(B, tb)
    b_pad = n_tiles * tb
    if b_pad != B:
        x = jnp.pad(x, ((0, b_pad - B), (0, 0)))

    # x stays f32 on the wire (cast happens in-kernel); weights go bf16 once, resident.
    args = [x]
    in_specs = [pl.BlockSpec((tb, d_in), lambda i: (i, 0))]

    # Hidden Linear layers: weight pre-transposed to (in, out) bf16, bias (1, out) f32.
    # Grid-invariant blocks (index_map -> (0, 0)) stay resident in VMEM across all steps.
    for w, b in zip(weights[:-1], biases[:-1]):
        wt = jnp.transpose(w).astype(jnp.bfloat16)           # (in, out)
        bb = b.reshape(1, -1).astype(jnp.float32)            # (1, out)
        args += [wt, bb]
        in_specs += [
            pl.BlockSpec(wt.shape, lambda i: (0, 0)),
            pl.BlockSpec(bb.shape, lambda i: (0, 0)),
        ]

    w_last, b_last = weights[-1], biases[-1]
    if vpu_tail:
        w_tail = w_last.reshape(1, -1).astype(jnp.float32)   # (1, hidden) - PyTorch (out,in) row
        b_tail = b_last.reshape(1, 1).astype(jnp.float32)    # (1, 1)
    else:
        w_tail = jnp.transpose(w_last).astype(jnp.bfloat16)  # (hidden, out)
        b_tail = b_last.reshape(1, -1).astype(jnp.float32)   # (1, out)
    args += [w_tail, b_tail]
    in_specs += [
        pl.BlockSpec(w_tail.shape, lambda i: (0, 0)),
        pl.BlockSpec(b_tail.shape, lambda i: (0, 0)),
    ]

    out = pl.pallas_call(
        _make_kernel(num_linear, vpu_tail),
        out_shape=jax.ShapeDtypeStruct((b_pad, out_dim), jnp.float32),
        grid_spec=pltpu.PrefetchScalarGridSpec(
            num_scalar_prefetch=0,
            grid=(n_tiles,),
            in_specs=in_specs,
            out_specs=pl.BlockSpec((tb, out_dim), lambda i: (i, 0)),
        ),
        compiler_params=pltpu.CompilerParams(
            dimension_semantics=("parallel",),   # independent batch tiles
        ),
    )(*args)
    return out[:B]


def init_params(key, input_dim=10, hidden_size=64, num_layers=3, output_dim=1):
    """nn.Linear-style init (uniform(-1/sqrt(fan_in), +1/sqrt(fan_in))), PyTorch (out,in) layout."""
    dims = [input_dim] + [hidden_size] * (num_layers - 1) + [output_dim]
    weights, biases = [], []
    for fan_in, fan_out in zip(dims[:-1], dims[1:]):
        key, kw, kb = jax.random.split(key, 3)
        bound = 1.0 / (fan_in ** 0.5)
        weights.append(jax.random.uniform(kw, (fan_out, fan_in), jnp.float32, -bound, bound))
        biases.append(jax.random.uniform(kb, (fan_out,), jnp.float32, -bound, bound))
    return weights, biases


def reference_forward(x, weights, biases):
    """Pure-JAX f32 reference matching the PyTorch module."""
    h = x
    for w, b in zip(weights[:-1], biases[:-1]):
        h = jnp.maximum(h @ w.T + b, 0.0)
    return h @ weights[-1].T + biases[-1]


if __name__ == "__main__":
    key = jax.random.PRNGKey(0)
    kx, kp = jax.random.split(key)

    # Default ConfigurableNet config: input_dim=10, hidden_size=64, num_layers=3, output_dim=1.
    B, D_IN, HIDDEN, N_LAYERS, D_OUT = 100, 10, 64, 3, 1
    x = jax.random.normal(kx, (B, D_IN), jnp.float32)
    weights, biases = init_params(kp, D_IN, HIDDEN, N_LAYERS, D_OUT)

    # tb=64 -> 2 pipelined grid steps + batch padding path exercised
    # (production batches would use tb=512-2048).
    out = configurable_net_forward(x, weights, biases, tb=64)
    out = jax.block_until_ready(out)

    ref = reference_forward(x, weights, biases)
    assert out.shape == (B, D_OUT)
    # bf16 operands on the MXU path -> relaxed tolerance vs the pure-f32 reference.
    max_err = float(jnp.max(jnp.abs(out - ref)))
    assert max_err < 5e-2, max_err
    print("KERNEL_OK")
</pallas_src>

<mosaic_0001>
module attributes {stable_mosaic.version = 11 : i64} {
  func.func @kernel(%arg0: i32, %arg1: memref<64x10xf32, #tpu.memory_space<vmem>>, %arg2: memref<10x64xbf16, #tpu.memory_space<vmem>>, %arg3: memref<1x64xf32, #tpu.memory_space<vmem>>, %arg4: memref<64x64xbf16, #tpu.memory_space<vmem>>, %arg5: memref<1x64xf32, #tpu.memory_space<vmem>>, %arg6: memref<1x64xf32, #tpu.memory_space<vmem>>, %arg7: memref<1x1xf32, #tpu.memory_space<vmem>>, %arg8: memref<64x1xf32, #tpu.memory_space<vmem>>) attributes {dimension_semantics = [#tpu.dimension_semantics<parallel>], iteration_bounds = array<i64: 2>, scalar_prefetch = 0 : i64, scratch_operands = 0 : i64, tpu.core_type = #tpu.core_type<tc>, window_params = [{transform_indices = @transform_0, window_bounds = array<i64: 64, 10>}, {pipeline_mode = #tpu.pipeline_mode<synchronous>, transform_indices = @transform_1, window_bounds = array<i64: 10, 64>}, {pipeline_mode = #tpu.pipeline_mode<synchronous>, transform_indices = @transform_2, window_bounds = array<i64: 1, 64>}, {pipeline_mode = #tpu.pipeline_mode<synchronous>, transform_indices = @transform_3, window_bounds = array<i64: 64, 64>}, {pipeline_mode = #tpu.pipeline_mode<synchronous>, transform_indices = @transform_4, window_bounds = array<i64: 1, 64>}, {pipeline_mode = #tpu.pipeline_mode<synchronous>, transform_indices = @transform_5, window_bounds = array<i64: 1, 64>}, {pipeline_mode = #tpu.pipeline_mode<synchronous>, transform_indices = @transform_6, window_bounds = array<i64: 1, 1>}, {transform_indices = @transform_7, window_bounds = array<i64: 64, 1>}]} {
    %c0 = arith.constant 0 : index
    %c0_0 = arith.constant 0 : index
    %0 = vector.load %arg1[%c0, %c0_0] : memref<64x10xf32, #tpu.memory_space<vmem>>, vector<64x10xf32>
    %1 = arith.truncf %0 : vector<64x10xf32> to vector<64x10xbf16>
    %c0_1 = arith.constant 0 : index
    %c0_2 = arith.constant 0 : index
    %2 = vector.load %arg2[%c0_1, %c0_2] : memref<10x64xbf16, #tpu.memory_space<vmem>>, vector<10x64xbf16>
    %cst = arith.constant dense<0.000000e+00> : vector<64x64xf32>
    %3 = tpu.matmul %1, %2, %cst {dimension_numbers = #tpu.dot_dimension_numbers<[1], [0], [0], [1], [0, 0, 1, 1], [], []>} : vector<64x10xbf16>, vector<10x64xbf16>, vector<64x64xf32> -> vector<64x64xf32>
    %c0_3 = arith.constant 0 : index
    %c0_4 = arith.constant 0 : index
    %4 = vector.load %arg3[%c0_3, %c0_4] : memref<1x64xf32, #tpu.memory_space<vmem>>, vector<1x64xf32>
    %5 = vector.broadcast %4 : vector<1x64xf32> to vector<64x64xf32>
    %6 = arith.addf %3, %5 : vector<64x64xf32>
    %cst_5 = arith.constant 0.000000e+00 : f32
    %7 = vector.broadcast %cst_5 : f32 to vector<64x64xf32>
    %8 = arith.maximumf %6, %7 : vector<64x64xf32>
    %9 = arith.truncf %8 : vector<64x64xf32> to vector<64x64xbf16>
    %c0_6 = arith.constant 0 : index
    %c0_7 = arith.constant 0 : index
    %10 = vector.load %arg4[%c0_6, %c0_7] : memref<64x64xbf16, #tpu.memory_space<vmem>>, vector<64x64xbf16>
    %cst_8 = arith.constant dense<0.000000e+00> : vector<64x64xf32>
    %11 = tpu.matmul %9, %10, %cst_8 {dimension_numbers = #tpu.dot_dimension_numbers<[1], [0], [0], [1], [0, 0, 1, 1], [], []>} : vector<64x64xbf16>, vector<64x64xbf16>, vector<64x64xf32> -> vector<64x64xf32>
    %c0_9 = arith.constant 0 : index
    %c0_10 = arith.constant 0 : index
    %12 = vector.load %arg5[%c0_9, %c0_10] : memref<1x64xf32, #tpu.memory_space<vmem>>, vector<1x64xf32>
    %13 = vector.broadcast %12 : vector<1x64xf32> to vector<64x64xf32>
    %14 = arith.addf %11, %13 : vector<64x64xf32>
    %cst_11 = arith.constant 0.000000e+00 : f32
    %15 = vector.broadcast %cst_11 : f32 to vector<64x64xf32>
    %16 = arith.maximumf %14, %15 : vector<64x64xf32>
    %17 = arith.truncf %16 : vector<64x64xf32> to vector<64x64xbf16>
    %c0_12 = arith.constant 0 : index
    %c0_13 = arith.constant 0 : index
    %18 = vector.load %arg6[%c0_12, %c0_13] : memref<1x64xf32, #tpu.memory_space<vmem>>, vector<1x64xf32>
    %19 = arith.extf %17 : vector<64x64xbf16> to vector<64x64xf32>
    %20 = vector.broadcast %18 : vector<1x64xf32> to vector<64x64xf32>
    %21 = arith.mulf %19, %20 : vector<64x64xf32>
    %cst_14 = arith.constant dense<0.000000e+00> : vector<64xf32>
    %22 = vector.multi_reduction <add>, %21, %cst_14 [1] : vector<64x64xf32> to vector<64xf32>
    %23 = vector.shape_cast %22 : vector<64xf32> to vector<64x1xf32>
    %c0_15 = arith.constant 0 : index
    %c0_16 = arith.constant 0 : index
    %24 = vector.load %arg7[%c0_15, %c0_16] : memref<1x1xf32, #tpu.memory_space<vmem>>, vector<1x1xf32>
    %25 = vector.broadcast %24 : vector<1x1xf32> to vector<64x1xf32>
    %26 = arith.addf %23, %25 : vector<64x1xf32>
    %c0_17 = arith.constant 0 : index
    %c0_18 = arith.constant 0 : index
    %27 = vector.load %arg8[%c0_17, %c0_18] : memref<64x1xf32, #tpu.memory_space<vmem>>, vector<64x1xf32>
    tpu.vector_store %arg8[%c0_17, %c0_18], %26 {strides = array<i32>} : memref<64x1xf32, #tpu.memory_space<vmem>>, vector<64x1xf32>,
    return
  }
  func.func @transform_0(%arg0: i32) -> (i32, i32) {
    %c0_i32 = arith.constant 0 : i32
    %c0_i32_0 = arith.constant 0 : i32
    return %arg0, %c0_i32 : i32, i32
  }
  func.func @transform_1(%arg0: i32) -> (i32, i32) {
    %c0_i32 = arith.constant 0 : i32
    %c0_i32_0 = arith.constant 0 : i32
    %c0_i32_1 = arith.constant 0 : i32
    return %c0_i32, %c0_i32_0 : i32, i32
  }
  func.func @transform_2(%arg0: i32) -> (i32, i32) {
    %c0_i32 = arith.constant 0 : i32
    %c0_i32_0 = arith.constant 0 : i32
    %c0_i32_1 = arith.constant 0 : i32
    return %c0_i32, %c0_i32_0 : i32, i32
  }
  func.func @transform_3(%arg0: i32) -> (i32, i32) {
    %c0_i32 = arith.constant 0 : i32
    %c0_i32_0 = arith.constant 0 : i32
    %c0_i32_1 = arith.constant 0 : i32
    return %c0_i32, %c0_i32_0 : i32, i32
  }
  func.func @transform_4(%arg0: i32) -> (i32, i32) {
    %c0_i32 = arith.constant 0 : i32
    %c0_i32_0 = arith.constant 0 : i32
    %c0_i32_1 = arith.constant 0 : i32
    return %c0_i32, %c0_i32_0 : i32, i32
  }
  func.func @transform_5(%arg0: i32) -> (i32, i32) {
    %c0_i32 = arith.constant 0 : i32
    %c0_i32_0 = arith.constant 0 : i32
    %c0_i32_1 = arith.constant 0 : i32
    return %c0_i32, %c0_i32_0 : i32, i32
  }
  func.func @transform_6(%arg0: i32) -> (i32, i32) {
    %c0_i32 = arith.constant 0 : i32
    %c0_i32_0 = arith.constant 0 : i32
    %c0_i32_1 = arith.constant 0 : i32
    return %c0_i32, %c0_i32_0 : i32, i32
  }
  func.func @transform_7(%arg0: i32) -> (i32, i32) {
    %c0_i32 = arith.constant 0 : i32
    %c0_i32_0 = arith.constant 0 : i32
    return %arg0, %c0_i32 : i32, i32
  }
}

</mosaic_0001>

<bundles_post_ra>
// kernel: tpu_custom_call.1
= control target key start
LH: loop header
LB: loop body
LE: loop exit
PB: predicated region body
PF: predicated region fallthrough
CT: control target
= control target key end

     0   :  { %s801_s26 = smov 0   ;;  %s873_s0 = inlined_call_operand.vmem [shape: f32[128,10], index: 0, kind: input, shape index: {}]   ;;  %s874_s1 = inlined_call_operand.vmem [shape: bf16[10,64], index: 1, kind: input, shape index: {}]   ;;  %s875_s2 = inlined_call_operand.vmem [shape: f32[1,64], index: 2, kind: input, shape index: {}]   ;;  %s876_s3 = inlined_call_operand.vmem [shape: bf16[64,64], index: 3, kind: input, shape index: {}]   ;;  %s877_s4 = inlined_call_operand.vmem [shape: f32[1,64], index: 4, kind: input, shape index: {}]   ;;  %s878_s5 = inlined_call_operand.vmem [shape: f32[1,64], index: 5, kind: input, shape index: {}]   ;;  %s879_s6 = inlined_call_operand.<no memory space> [shape: f32[1,1], index: 6, kind: input, shape index: {}]   ;;  %s880_s7 = inlined_call_operand.vmem [shape: f32[128,1], index: 7, kind: output, shape index: {}]  }
   0x1   :  { %v12_v0 = vstv %s879_s6 }
   0x2   :  { %13 = vst [vmem:[#allocation2] sm:$0x1] %v12_v0 }
   0x3 LB: > { %s661_s27 = sadd.s32 4294967295, %s756_s26   ;;  %p665_p0 = scmp.ge.s32.totalorder %s756_s26, 1  ;;  %s756_s26 = sphi %s801_s26, %s19_s26  }
   0x4   : > { %p240_p1 = scmp.lt.s32.totalorder %s756_s26, 3 }
   0x6   : > { %p241_p2 = pnand %p665_p0, %p240_p1 }
   0x7   : > { %v745_v1 = vld [vmem:[%s874_s1] sm:$0x1f] (!%p241_p2)   ;;  %vm324_vm0 = vcmask (!%p241_p2), 1044480   ;;  %s666_s6 = sshll.u32 (!%p241_p2), %s661_s27, 3  ;;  %v747_v4 = vld [vmem:[%s876_s3 + $0x8] sm:$0xff] (!%p241_p2)   ;;  %vm311_vm1 = vcmask (!%p241_p2), 80896  }
   0x8   : > { %244 = sbr.rel (%p241_p2) target bundleno = 627 (0x273), region = 48  ;;  %v746_v2 = vld [vmem:[%s876_s3] sm:$0xff] (!%p241_p2)   ;;  %736 = vmatprep.subr.msk.bf16.mxu0 (!%p241_p2), %vm324_vm0, %v745_v1  ;;  %v326_v3 = vsel (!%p241_p2), %vm324_vm0, %v745_v1, 0  ;;  %p273_p3 = scmp.lt.s32.totalorder (!%p241_p2), %s666_s6, 15  ;;  %v748_v17 = vld [vmem:[%s876_s3 + $0x10] sm:$0xff] (!%p241_p2)   ;;  %v749_v18 = vld [vmem:[%s876_s3 + $0x18] sm:$0xff] (!%p241_p2)  }
   0x9   : > { %703 = vmatpush3.bf16.msra.mxu0 (!%p241_p2), %v326_v3  ;;  %728 = vmatprep.subr.bf16.mxu1 (!%p241_p2), %v746_v2  ;;  %v670_v19 = vld [vmem:[%s875_s2] ss:$0 sm:$0xff] (!%p241_p2)  ;;  %vm444_vm2 = vcmask (!%p241_p2), 523264   ;;  %vm596_vm3 = vcmask (!%p241_p2), 7168  }
   0xa   : > { %712 = vmatprep.subr.bf16.mxu0 (!%p241_p2), %v746_v2  ;;  %732 = vmatpush3.bf16.msra.mxu1 (!%p241_p2), %v746_v2  ;;  %v676_v48 = vld [vmem:[%s877_s4] ss:$0 sm:$0xff] (!%p241_p2) }
   0xb   : > { %729 = vmatprep.subr.bf16.mxu1 (!%p241_p2), %v747_v4  ;;  %v685_v0 = vld [vmem:[%s878_s5] ss:$0 sm:$0xff] (!%p241_p2) }
   0xe   : > { %733 = vmatpush3.bf16.msra.mxu1 (!%p241_p2), %v747_v4 }
   0xf   : > { %s882_s6 = smov (!%p273_p3, %s666_s6), 15  ;;  %730 = vmatprep.subr.bf16.mxu1 %v748_v17 }
  0x10   : > { %s667_s11 = sshll.u32 %s882_s6, 3 }
  0x11   : > { %s276_s14 = scalar_lea.vmem %s873_s0, %s667_s11  ;;  %s282_s28 = scalar_lea.vmem %s880_s7, %s667_s11 }
  0x12   : > { %v285_v5 = vld [vmem:[%s276_s14] sm:$0xff]  ;;  %v286_v6 = vld [vmem:[%s276_s14 + $0x8] sm:$0xff]  ;;  %v287_v7 = vld [vmem:[%s276_s14 + $0x10] sm:$0xff]  ;;  %734 = vmatpush3.bf16.msra.mxu1 %v748_v17 }
  0x13   : > { %v293_v8 = vpack.c.bf16 %v286_v6, %v285_v5  ;;  %v288_v9 = vld [vmem:[%s276_s14 + $0x18] sm:$0xff]  ;;  %v289_v10 = vld [vmem:[%s276_s14 + $0x20] sm:$0xff]  ;;  %v290_v11 = vld [vmem:[%s276_s14 + $0x28] sm:$0xff]  ;;  %731 = vmatprep.subr.bf16.mxu1 %v749_v18 }
  0x14   : > { %v294_v12 = vpack.c.bf16 %v288_v9, %v287_v7  ;;  %v295_v13 = vpack.c.bf16 %v290_v11, %v289_v10  ;;  %v291_v14 = vld [vmem:[%s276_s14 + $0x30] sm:$0xff]  ;;  %v292_v15 = vld [vmem:[%s276_s14 + $0x38] sm:$0xff] }
  0x15   : > { %704 = vmatprep.mubr.msk.bf16.mxu0 %vm311_vm1, %v293_v8  ;;  %v296_v16 = vpack.c.bf16 %v292_v15, %v291_v14 }
  0x16   : > { %705 = vmatmul.mubr.msk.bf16.vlgmr.msra.gmra.mrb[0].mxu0 %vm311_vm1, %v294_v12  ;;  %735 = vmatpush3.bf16.msra.mxu1 %v749_v18 }
  0x17   : > { %708 = vmatprep.mubr.msk.bf16.mxu0 %vm311_vm1, %v295_v13  ;;  %713 = vmatpush3.bf16.msra.mxu0 %v746_v2 }
  0x18   : > { %714 = vmatprep.subr.bf16.mxu0 %v747_v4 }
  0x1b   : > { %715 = vmatpush3.bf16.msra.mxu0 %v747_v4 }
  0x1c   : > { %716 = vmatprep.subr.bf16.mxu0 %v748_v17 }
  0x1e   : > { %709 = vmatmul.mubr.msk.bf16.gmra.mrb[4].mxu0 %vm311_vm1, %v296_v16 }
  0x1f   : > { %717 = vmatpush3.bf16.msra.mxu0 %v748_v17 }
  0x20   : > { %718 = vmatprep.subr.bf16.mxu0 %v749_v18 }
  0x23   : > { %719 = vmatpush3.bf16.msra.mxu0 %v749_v18 }
  0xe9   : > { %v706_v20 = vpop.f32.mrb[0].mxu0 }
  0xea   : > { %v371_v21 = vadd.f32 %v706_v20, %v670_v19  ;;  %v362_v22 = vpop.f32.mrb[1].mxu0 }
  0xeb   : > { %v363_v23 = vadd.f32 %v670_v19, %v362_v22  ;;  %v707_v24 = vpop.f32.mrb[2].mxu0 }
  0xec   : > { %v374_v25 = vadd.f32 %v707_v24, %v670_v19  ;;  %v365_v26 = vpop.f32.mrb[3].mxu0  ;;  %v395_v28 = vmax.f32 %v371_v21, 0.0 }
  0xed   : > { %v366_v27 = vadd.f32 %v670_v19, %v365_v26  ;;  %v393_v30 = vmax.f32 %v363_v23, 0.0 }
  0xee   : > { %v396_v29 = vmax.f32 %v374_v25, 0.0 }
  0xef   : > { %v394_v31 = vmax.f32 %v366_v27, 0.0 }
  0xf0   : > { %v402_v32 = vpack.c.bf16 %v396_v29, %v395_v28 }
  0xf1   : > { %v401_v33 = vpack.c.bf16 %v394_v31, %v393_v30  ;;  %v710_v34 = vpop.f32.mrb[4].mxu0 }
  0xf2   : > { %v387_v35 = vadd.f32 %v710_v34, %v670_v19  ;;  %v378_v36 = vpop.f32.mrb[5].mxu0 }
  0xf3   : > { %v379_v37 = vadd.f32 %v670_v19, %v378_v36  ;;  %v711_v38 = vpop.f32.mrb[6].mxu0  ;;  %720 = vmatprep.mubr.msk.bf16.mxu0 %vm444_vm2, %v401_v33 }
  0xf4   : > { %v390_v39 = vadd.f32 %v711_v38, %v670_v19  ;;  %v381_v40 = vpop.f32.mrb[7].mxu0  ;;  %721 = vmatmul.mubr.msk.bf16.vlgmr.msra.gmra.mrb[8].mxu0 %vm444_vm2, %v402_v32  ;;  %v399_v42 = vmax.f32 %v387_v35, 0.0  ;;  %v686_v38 = vld [vmem:[#allocation2] ss:$0 sm:$0xff] }
  0xf5   : > { %v382_v41 = vadd.f32 %v670_v19, %v381_v40  ;;  %v397_v44 = vmax.f32 %v379_v37, 0.0 }
  0xf6   : > { %v400_v43 = vmax.f32 %v390_v39, 0.0 }
  0xf7   : > { %v398_v45 = vmax.f32 %v382_v41, 0.0 }
  0xf8   : > { %v404_v46 = vpack.c.bf16 %v400_v43, %v399_v42 }
  0xf9   : > { %v403_v47 = vpack.c.bf16 %v398_v45, %v397_v44 }
  0xfb   : > { %724 = vmatprep.mubr.msk.bf16.mxu1 %vm444_vm2, %v403_v47 }
  0xfc   : > { %725 = vmatmul.mubr.msk.bf16.vlgmr.msra.gmra.mrb[0].mxu1 %vm444_vm2, %v404_v46 }
 0x1c7   : > { %v722_v49 = vpop.f32.mrb[8].mxu0 }
 0x1c8   : > { %v500_v50 = vadd.f32 %v722_v49, %v676_v48  ;;  %v491_v51 = vpop.f32.mrb[9].mxu0 }
 0x1c9   : > { %v492_v52 = vadd.f32 %v676_v48, %v491_v51  ;;  %v723_v53 = vpop.f32.mrb[10].mxu0 }
 0x1ca   : > { %v503_v54 = vadd.f32 %v723_v53, %v676_v48  ;;  %v494_v55 = vpop.f32.mrb[11].mxu0  ;;  %v524_v57 = vmax.f32 %v500_v50, 0.0 }
 0x1cb   : > { %v495_v56 = vadd.f32 %v676_v48, %v494_v55  ;;  %v522_v59 = vmax.f32 %v492_v52, 0.0 }
 0x1cc   : > { %v525_v58 = vmax.f32 %v503_v54, 0.0 }
 0x1cd   : > { %v523_v60 = vmax.f32 %v495_v56, 0.0 }
 0x1ce   : > { %v531_v61 = vpack.c.bf16 %v525_v58, %v524_v57 }
 0x1cf   : > { %v530_v62 = vpack.c.bf16 %v523_v60, %v522_v59  ;;  %v726_v63 = vpop.f32.mrb[0].mxu1 }
 0x1d0   : > { %v516_v1 = vadd.f32 %v726_v63, %v676_v48  ;;  %v507_v2 = vpop.f32.mrb[1].mxu1  ;;  %v537_v3 = vunpack.c.l.bf16 %v531_v61  ;;  %v538_v4 = vunpack.c.h.bf16 %v531_v61 }
 0x1d1   : > { %v508_v5 = vadd.f32 %v676_v48, %v507_v2  ;;  %v727_v6 = vpop.f32.mrb[2].mxu1  ;;  %v535_v7 = vunpack.c.l.bf16 %v530_v62  ;;  %v536_v8 = vunpack.c.h.bf16 %v530_v62 }
 0x1d2   : > { %v519_v9 = vadd.f32 %v727_v6, %v676_v48  ;;  %v510_v10 = vpop.f32.mrb[3].mxu1  ;;  %v551_v11 = vmul.f32 %v685_v0, %v537_v3  ;;  %v528_v12 = vmax.f32 %v516_v1, 0.0  ;;  %v552_v17 = vmul.f32 %v685_v0, %v538_v4 }
 0x1d3   : > { %v511_v13 = vadd.f32 %v676_v48, %v510_v10  ;;  %v549_v14 = vmul.f32 %v685_v0, %v535_v7  ;;  %v550_v18 = vmul.f32 %v685_v0, %v536_v8  ;;  %v526_v19 = vmax.f32 %v508_v5, 0.0 }
 0x1d4   : > { %v529_v15 = vmax.f32 %v519_v9, 0.0  ;;  %v563_v16 = vsel %vm444_vm2, %v551_v11, 0.0  ;;  %v566_v24 = vsel %vm444_vm2, %v552_v17, 0.0 }
 0x1d5   : > { %v527_v20 = vmax.f32 %v511_v13, 0.0  ;;  %564 = vadd.xlane.f32.xlu1 %v563_v16  ;;  %v557_v21 = vsel %vm444_vm2, %v549_v14, 0.0  ;;  %v560_v25 = vsel %vm444_vm2, %v550_v18, 0.0 }
 0x1d6   : > { %v533_v22 = vpack.c.bf16 %v529_v15, %v528_v12  ;;  %558 = vadd.xlane.f32.xlu0 %v557_v21 }
 0x1d7   : > { %v532_v23 = vpack.c.bf16 %v527_v20, %v526_v19 }
 0x1d8   : > { %v542_v28 = vunpack.c.h.bf16 %v533_v22  ;;  %v541_v29 = vunpack.c.l.bf16 %v533_v22 }
 0x1d9   : > { %567 = vadd.xlane.f32.xlu1 %v566_v24  ;;  %v540_v26 = vunpack.c.h.bf16 %v532_v23  ;;  %v539_v27 = vunpack.c.l.bf16 %v532_v23 }
 0x1da   : > { %561 = vadd.xlane.f32.xlu0 %v560_v25  ;;  %v556_v34 = vmul.f32 %v685_v0, %v542_v28  ;;  %v555_v35 = vmul.f32 %v685_v0, %v541_v29 }
 0x1db   : > { %v554_v30 = vmul.f32 %v685_v0, %v540_v26  ;;  %v553_v31 = vmul.f32 %v685_v0, %v539_v27 }
 0x1dc   : > { %v578_v36 = vsel %vm444_vm2, %v556_v34, 0.0  ;;  %v575_v37 = vsel %vm444_vm2, %v555_v35, 0.0 }
 0x1dd   : > { %v572_v32 = vsel %vm444_vm2, %v554_v30, 0.0  ;;  %v569_v33 = vsel %vm444_vm2, %v553_v31, 0.0 }
 0x1de   : > { %573 = vadd.xlane.f32.xlu1 %v572_v32  ;;  %570 = vadd.xlane.f32.xlu0 %v569_v33 }
 0x1e2   : > { %579 = vadd.xlane.f32.xlu1 %v578_v36  ;;  %576 = vadd.xlane.f32.xlu0 %v575_v37 }
 0x262   : > { %v565_v39 = vpop.xlane.xlu1 %564 }
 0x263   : > { %v590_v40 = vadd.f32 %v686_v38, %v565_v39  ;;  %v559_v41 = vpop.xlane.xlu0 %558 }
 0x264   : > { %v588_v42 = vadd.f32 %v686_v38, %v559_v41 }
 0x265   : > { %599 = vst.msk [vmem:[%s282_s28 + $0x10] sm:$0xff] %vm596_vm3, %v590_v40 }
 0x266   : > { %597 = vst.msk [vmem:[%s282_s28] sm:$0xff] %vm596_vm3, %v588_v42  ;;  %v568_v43 = vpop.xlane.xlu1 %567 }
 0x267   : > { %v591_v44 = vadd.f32 %v686_v38, %v568_v43  ;;  %v562_v45 = vpop.xlane.xlu0 %561 }
 0x268   : > { %v589_v46 = vadd.f32 %v686_v38, %v562_v45 }
 0x269   : > { %600 = vst.msk [vmem:[%s282_s28 + $0x18] sm:$0xff] %vm596_vm3, %v591_v44 }
 0x26a   : > { %598 = vst.msk [vmem:[%s282_s28 + $0x8] sm:$0xff] %vm596_vm3, %v589_v46 }
 0x26b   : > { %v574_v47 = vpop.xlane.xlu1 %573  ;;  %v571_v48 = vpop.xlane.xlu0 %570 }
 0x26c   : > { %v593_v49 = vadd.f32 %v686_v38, %v574_v47  ;;  %v592_v50 = vadd.f32 %v686_v38, %v571_v48 }
 0x26e   : > { %602 = vst.msk [vmem:[%s282_s28 + $0x28] sm:$0xff] %vm596_vm3, %v593_v49  ;;  %601 = vst.msk [vmem:[%s282_s28 + $0x20] sm:$0xff] %vm596_vm3, %v592_v50 }
 0x26f   : > { %v580_v51 = vpop.xlane.xlu1 %579  ;;  %v577_v52 = vpop.xlane.xlu0 %576 }
 0x270   : > { %v595_v53 = vadd.f32 %v686_v38, %v580_v51  ;;  %v594_v54 = vadd.f32 %v686_v38, %v577_v52 }
 0x272   : > { %604 = vst.msk [vmem:[%s282_s28 + $0x38] sm:$0xff] %vm596_vm3, %v595_v53  ;;  %603 = vst.msk [vmem:[%s282_s28 + $0x30] sm:$0xff] %vm596_vm3, %v594_v54 }
 0x273 PF: > { %s19_s26 = sadd.s32 1, %s756_s26  }
 0x274   : > { %p16_p4 = scmp.ge.s32.totalorder %s19_s26, 4  }
 0x276   :  { %18 = sbr.rel (!%p16_p4) target bundleno = 3 (0x3), region = 78 }

</bundles_post_ra>
